<compile_context>
chip_gen: v7x
topology: tpu7x:2x2x1
jax: 0.10.0
libtpu: 0.0.40
codegen_flags: <defaults>
</compile_context>

<pallas_src>
import functools

import jax
import jax.numpy as jnp
from jax import lax
from jax.experimental import pallas as pl
from jax.experimental.pallas import tpu as pltpu

_INV_SQRT2 = 0.7071067811865476


def _gelu_exact(x):
    # torch.nn.GELU() default (approximate='none'): 0.5 * x * (1 + erf(x / sqrt(2)))
    return 0.5 * x * (1.0 + lax.erf(x * _INV_SQRT2))


def _round_up(v, m):
    return (v + m - 1) // m * m


def _moe_kernel(x_ref, g_ref, w1_ref, b1_ref, w2_ref, b2_ref, w3_ref, b3_ref,
                out_ref, *, compute_dtype):
    e = pl.program_id(1)

    # Output block is resident across the trailing "arbitrary" expert axis: zero it once at
    # e == 0 and accumulate into it directly (no separate accumulator scratch / finalize).
    @pl.when(e == 0)
    def _():
        out_ref[...] = jnp.zeros_like(out_ref)

    # Select column e of the pre-computed (tm, E) gate matrix (router hoisted to wrapper).
    # E is tiny, so this iota/select/row-reduce is a handful of VALU + XLU ops.
    g = g_ref[...]                                                        # (tm, E) f32
    col = lax.broadcasted_iota(jnp.int32, g.shape, 1)
    gate = jnp.sum(jnp.where(col == e, g, 0.0), axis=-1, keepdims=True)   # (tm, 1)

    # Expert e MLP: bf16 MXU operands, f32 accumulation & element-wise math, exact erf GELU.
    x = x_ref[...]                                                        # (tm, dmp) bf16
    h = jnp.dot(x, w1_ref[0], preferred_element_type=jnp.float32) + b1_ref[0]
    h = _gelu_exact(h)
    h = jnp.dot(h.astype(compute_dtype), w2_ref[0],
                preferred_element_type=jnp.float32) + b2_ref[0]
    h = _gelu_exact(h)
    o = jnp.dot(h.astype(compute_dtype), w3_ref[0],
                preferred_element_type=jnp.float32) + b3_ref[0]

    out_ref[...] += gate * o


def fmoe_transformer_mlp(x, params, *, top_k, tm=512, compute_dtype=jnp.bfloat16):
    """x: (B, N, d_model) float32. params: dict of stacked expert parameters."""
    et = params["expert_tokens"]                 # (E, d_model)
    w1, b1 = params["w1"], params["b1"]          # (E, d_model, d_hidden), (E, 1, d_hidden)
    w2, b2 = params["w2"], params["b2"]          # (E, d_hidden, d_hidden), (E, 1, d_hidden)
    w3, b3 = params["w3"], params["b3"]          # (E, d_hidden, d_model),  (E, 1, d_model)

    B, N, d_model = x.shape
    E = et.shape[0]
    d_hidden = w1.shape[-1]
    tok = B * N

    # ---- Router (hoisted out of the kernel): identical math to the PyTorch forward; the
    # top-k tie-break is the exact lax.top_k / torch.topk behaviour on f32 scores.
    x_flat = x.reshape(tok, d_model).astype(jnp.float32)
    scores = jnp.dot(x_flat, et.astype(jnp.float32).T)                   # (tok, E)
    _, topk_idx = lax.top_k(scores, top_k)                               # (tok, top_k)
    gates = jax.nn.one_hot(topk_idx, E, dtype=jnp.float32).sum(axis=1) / top_k  # (tok, E)

    # ---- Lane-dense padding (feature dims to multiples of 128); zero padding is exact
    # (GELU(0) = 0 keeps pad lanes at 0, and padded token rows get zero gates).
    dmp = _round_up(d_model, 128)
    dhp = _round_up(d_hidden, 128)
    wb = jnp.dtype(compute_dtype).itemsize
    e_lanes = _round_up(E, 128)

    tm = _round_up(max(8, min(tm, _round_up(tok, 8))), 8)

    def _vmem_bytes(tm_):
        return (
            2 * tm_ * dmp * wb                                 # x tile (double-buffered, bf16)
            + 2 * tm_ * e_lanes * 4                            # gate tile (2x buf, lane-padded)
            + 2 * (dmp * dhp + dhp * dhp + dhp * dmp) * wb     # one expert's weights (2x buf)
            + 2 * 3 * 8 * max(dhp, dmp) * 4                    # biases (2x buf, sublane-padded)
            + 2 * tm_ * dmp * 4                                # resident/accumulating out tile
            + tm_ * dhp * (4 + 4 + 2)                          # f32 h + gelu temp + bf16 cast
            + tm_ * dmp * 4                                    # f32 o temp
        )

    try:
        vmem_cap = int(pltpu.get_tpu_info().vmem_capacity_bytes)
    except Exception:                                          # conservative fallback (v7x)
        vmem_cap = 64 << 20
    headroom = 6 << 20                                          # Mosaic internal scratch etc.

    # Shrink the token tile if the activation tiles would blow the device VMEM budget
    # (weights are tm-independent; if they alone do not fit, see the hidden-chunking TODO).
    while tm > 64 and _vmem_bytes(tm) > vmem_cap - headroom:
        tm = _round_up(tm // 2, 8)

    tok_p = _round_up(tok, tm)

    def pad_to(a, shape):
        return jnp.pad(a, [(0, s - d) for d, s in zip(a.shape, shape)])

    x_p = pad_to(x_flat.astype(compute_dtype), (tok_p, dmp))
    g_p = pad_to(gates, (tok_p, E))                              # zero gates on padded rows
    w1p = pad_to(w1, (E, dmp, dhp)).astype(compute_dtype)
    w2p = pad_to(w2, (E, dhp, dhp)).astype(compute_dtype)
    w3p = pad_to(w3, (E, dhp, dmp)).astype(compute_dtype)
    b1p = pad_to(b1.astype(jnp.float32), (E, 1, dhp))
    b2p = pad_to(b2.astype(jnp.float32), (E, 1, dhp))
    b3p = pad_to(b3.astype(jnp.float32), (E, 1, dmp))

    grid = (tok_p // tm, E)

    # Advisory cost hint for the XLA scheduler (weights are re-streamed once per token tile).
    mlp_flops = 2 * (dmp * dhp + dhp * dhp + dhp * dmp)
    w_bytes = (dmp * dhp + dhp * dhp + dhp * dmp) * wb
    cost = pl.CostEstimate(
        flops=int(tok_p * E * mlp_flops),
        transcendentals=int(tok_p * E * 2 * dhp),
        bytes_accessed=int(tok_p * dmp * (wb + 4) + tok_p * e_lanes * 4
                           + grid[0] * E * w_bytes),
    )

    cp_kwargs = dict(dimension_semantics=("parallel", "arbitrary"))
    need = _vmem_bytes(tm)
    if need > (30 << 20):
        cp_kwargs["vmem_limit_bytes"] = int(min(need + (4 << 20), vmem_cap - (2 << 20)))

    kernel = functools.partial(_moe_kernel, compute_dtype=compute_dtype)
    out_flat = pl.pallas_call(
        kernel,
        out_shape=jax.ShapeDtypeStruct((tok_p, dmp), jnp.float32),
        grid_spec=pltpu.PrefetchScalarGridSpec(
            num_scalar_prefetch=0,
            grid=grid,
            in_specs=[
                pl.BlockSpec((tm, dmp), lambda i, e: (i, 0)),         # x tile (const over e)
                pl.BlockSpec((tm, E), lambda i, e: (i, 0)),           # gates tile (const over e)
                pl.BlockSpec((1, dmp, dhp), lambda i, e: (e, 0, 0)),  # W1[e]
                pl.BlockSpec((1, 1, dhp), lambda i, e: (e, 0, 0)),    # b1[e]
                pl.BlockSpec((1, dhp, dhp), lambda i, e: (e, 0, 0)),  # W2[e]
                pl.BlockSpec((1, 1, dhp), lambda i, e: (e, 0, 0)),    # b2[e]
                pl.BlockSpec((1, dhp, dmp), lambda i, e: (e, 0, 0)),  # W3[e]
                pl.BlockSpec((1, 1, dmp), lambda i, e: (e, 0, 0)),    # b3[e]
            ],
            out_specs=pl.BlockSpec((tm, dmp), lambda i, e: (i, 0)),
        ),
        compiler_params=pltpu.CompilerParams(**cp_kwargs),
        cost_estimate=cost,
    )(x_p, g_p, w1p, b1p, w2p, b2p, w3p, b3p)

    return out_flat[:tok, :d_model].reshape(B, N, d_model).astype(x.dtype)


def _reference(x, params, top_k):
    """Plain-JAX (f32) reproduction of the PyTorch forward (for a sanity check)."""
    et = params["expert_tokens"]
    w1, b1 = params["w1"], params["b1"]
    w2, b2 = params["w2"], params["b2"]
    w3, b3 = params["w3"], params["b3"]
    E = et.shape[0]
    B, N, d = x.shape
    scores = (x.reshape(B * N, d) @ et.T).reshape(B, N, E)
    _, topk_idx = lax.top_k(scores, top_k)                    # (B, N, top_k)
    out = jnp.zeros_like(x)
    for e in range(E):
        mask = (topk_idx == e).astype(x.dtype).mean(axis=-1, keepdims=True)
        h = _gelu_exact(x @ w1[e] + b1[e])
        h = _gelu_exact(h @ w2[e] + b2[e])
        o = h @ w3[e] + b3[e]
        out = out + o * mask
    return out


def _init_params(key, num_expert, d_model, d_hidden):
    ks = jax.random.split(key, 7)
    s1 = 1.0 / (d_model ** 0.5)
    s2 = 1.0 / (d_hidden ** 0.5)
    return {
        "expert_tokens": jax.random.normal(ks[0], (num_expert, d_model), jnp.float32),
        "w1": jax.random.normal(ks[1], (num_expert, d_model, d_hidden), jnp.float32) * s1,
        "b1": jax.random.normal(ks[2], (num_expert, 1, d_hidden), jnp.float32) * 0.01,
        "w2": jax.random.normal(ks[3], (num_expert, d_hidden, d_hidden), jnp.float32) * s2,
        "b2": jax.random.normal(ks[4], (num_expert, 1, d_hidden), jnp.float32) * 0.01,
        "w3": jax.random.normal(ks[5], (num_expert, d_hidden, d_model), jnp.float32) * s2,
        "b3": jax.random.normal(ks[6], (num_expert, 1, d_model), jnp.float32) * 0.01,
    }


if __name__ == "__main__":
    # Small shapes consistent with the module: B=1 (required by the PyTorch view),
    # N=64 tokens, d_model=32, d_hidden=64, 4 experts, top_k=2.
    B, N, d_model, d_hidden = 1, 64, 32, 64
    num_expert, top_k = 4, 2

    key = jax.random.PRNGKey(0)
    kx, kp = jax.random.split(key)
    x = jax.random.normal(kx, (B, N, d_model), jnp.float32)
    params = _init_params(kp, num_expert, d_model, d_hidden)

    ref = jax.block_until_ready(_reference(x, params, top_k))

    # Default (large, clamped) token tile — single token tile, 4 expert grid steps.
    out = jax.block_until_ready(fmoe_transformer_mlp(x, params, top_k=top_k))
    assert out.shape == (B, N, d_model)
    assert jnp.allclose(out, ref, atol=5e-2, rtol=5e-2), "kernel mismatch vs reference"

    # Multi-tile token grid (exercises the parallel token axis + resident-output accumulation).
    out_tiled = jax.block_until_ready(fmoe_transformer_mlp(x, params, top_k=top_k, tm=16))
    assert jnp.allclose(out_tiled, ref, atol=5e-2, rtol=5e-2), "tiled kernel mismatch"

    print("KERNEL_OK")
</pallas_src>

<mosaic_0001>
module attributes {stable_mosaic.version = 11 : i64} {
  func.func @_moe_kernel(%arg0: i32, %arg1: i32, %arg2: memref<64x128xbf16, #tpu.memory_space<vmem>>, %arg3: memref<64x4xf32, #tpu.memory_space<vmem>>, %arg4: memref<1x128x128xbf16, #tpu.memory_space<vmem>>, %arg5: memref<1x1x128xf32, #tpu.memory_space<vmem>>, %arg6: memref<1x128x128xbf16, #tpu.memory_space<vmem>>, %arg7: memref<1x1x128xf32, #tpu.memory_space<vmem>>, %arg8: memref<1x128x128xbf16, #tpu.memory_space<vmem>>, %arg9: memref<1x1x128xf32, #tpu.memory_space<vmem>>, %arg10: memref<64x128xf32, #tpu.memory_space<vmem>>) attributes {dimension_semantics = [#tpu.dimension_semantics<parallel>, #tpu.dimension_semantics<arbitrary>], iteration_bounds = array<i64: 1, 4>, scalar_prefetch = 0 : i64, scratch_operands = 0 : i64, tpu.core_type = #tpu.core_type<tc>, window_params = [{transform_indices = @transform_0, window_bounds = array<i64: 64, 128>}, {transform_indices = @transform_1, window_bounds = array<i64: 64, 4>}, {transform_indices = @transform_2, window_bounds = array<i64: 1, 128, 128>}, {transform_indices = @transform_3, window_bounds = array<i64: 1, 1, 128>}, {transform_indices = @transform_4, window_bounds = array<i64: 1, 128, 128>}, {transform_indices = @transform_5, window_bounds = array<i64: 1, 1, 128>}, {transform_indices = @transform_6, window_bounds = array<i64: 1, 128, 128>}, {transform_indices = @transform_7, window_bounds = array<i64: 1, 1, 128>}, {transform_indices = @transform_8, window_bounds = array<i64: 64, 128>}]} {
    %c0_i32 = arith.constant 0 : i32
    %0 = arith.cmpi eq, %arg1, %c0_i32 : i32
    %1 = arith.extui %0 : i1 to i32
    %c0_i32_0 = arith.constant 0 : i32
    %2 = arith.cmpi ne, %1, %c0_i32_0 : i32
    scf.if %2 {
      %cst_36 = arith.constant 0.000000e+00 : f32
      %56 = vector.broadcast %cst_36 : f32 to vector<64x128xf32>
      %c0_37 = arith.constant 0 : index
      %c0_38 = arith.constant 0 : index
      %57 = vector.load %arg10[%c0_37, %c0_38] : memref<64x128xf32, #tpu.memory_space<vmem>>, vector<64x128xf32>
      tpu.vector_store %arg10[%c0_37, %c0_38], %56 {strides = array<i32>} : memref<64x128xf32, #tpu.memory_space<vmem>>, vector<64x128xf32>,
    } else {
    }
    %c0 = arith.constant 0 : index
    %c0_1 = arith.constant 0 : index
    %3 = vector.load %arg3[%c0, %c0_1] : memref<64x4xf32, #tpu.memory_space<vmem>>, vector<64x4xf32>
    %4 = tpu.iota {dimensions = array<i32: 1>} : vector<64x4xi32>
    %5 = vector.broadcast %arg1 : i32 to vector<64x4xi32>
    %6 = arith.cmpi eq, %4, %5 : vector<64x4xi32>
    %cst = arith.constant 0.000000e+00 : f32
    %7 = vector.broadcast %cst : f32 to vector<64x4xf32>
    %8 = arith.select %6, %3, %7 : vector<64x4xi1>, vector<64x4xf32>
    %cst_2 = arith.constant dense<0.000000e+00> : vector<64xf32>
    %9 = vector.multi_reduction <add>, %8, %cst_2 [1] : vector<64x4xf32> to vector<64xf32>
    %10 = vector.shape_cast %9 : vector<64xf32> to vector<64x1xf32>
    %c0_3 = arith.constant 0 : index
    %c0_4 = arith.constant 0 : index
    %11 = vector.load %arg2[%c0_3, %c0_4] : memref<64x128xbf16, #tpu.memory_space<vmem>>, vector<64x128xbf16>
    %c0_5 = arith.constant 0 : index
    %c0_6 = arith.constant 0 : index
    %c0_7 = arith.constant 0 : index
    %12 = vector.load %arg4[%c0_5, %c0_6, %c0_7] : memref<1x128x128xbf16, #tpu.memory_space<vmem>>, vector<1x128x128xbf16>
    %13 = vector.shape_cast %12 : vector<1x128x128xbf16> to vector<128x128xbf16>
    %cst_8 = arith.constant dense<0.000000e+00> : vector<64x128xf32>
    %14 = tpu.matmul %11, %13, %cst_8 {dimension_numbers = #tpu.dot_dimension_numbers<[1], [0], [0], [1], [0, 0, 1, 1], [], []>} : vector<64x128xbf16>, vector<128x128xbf16>, vector<64x128xf32> -> vector<64x128xf32>
    %c0_9 = arith.constant 0 : index
    %c0_10 = arith.constant 0 : index
    %c0_11 = arith.constant 0 : index
    %15 = vector.load %arg5[%c0_9, %c0_10, %c0_11] : memref<1x1x128xf32, #tpu.memory_space<vmem>>, vector<1x1x128xf32>
    %16 = vector.shape_cast %15 : vector<1x1x128xf32> to vector<1x128xf32>
    %17 = vector.broadcast %16 : vector<1x128xf32> to vector<64x128xf32>
    %18 = arith.addf %14, %17 : vector<64x128xf32>
    %cst_12 = arith.constant 5.000000e-01 : f32
    %19 = vector.broadcast %cst_12 : f32 to vector<64x128xf32>
    %20 = arith.mulf %19, %18 : vector<64x128xf32>
    %cst_13 = arith.constant 0.707106769 : f32
    %21 = vector.broadcast %cst_13 : f32 to vector<64x128xf32>
    %22 = arith.mulf %18, %21 : vector<64x128xf32>
    %23 = math.erf %22 : vector<64x128xf32>
    %cst_14 = arith.constant 1.000000e+00 : f32
    %24 = vector.broadcast %cst_14 : f32 to vector<64x128xf32>
    %25 = arith.addf %24, %23 : vector<64x128xf32>
    %26 = arith.mulf %20, %25 : vector<64x128xf32>
    %27 = arith.truncf %26 : vector<64x128xf32> to vector<64x128xbf16>
    %c0_15 = arith.constant 0 : index
    %c0_16 = arith.constant 0 : index
    %c0_17 = arith.constant 0 : index
    %28 = vector.load %arg6[%c0_15, %c0_16, %c0_17] : memref<1x128x128xbf16, #tpu.memory_space<vmem>>, vector<1x128x128xbf16>
    %29 = vector.shape_cast %28 : vector<1x128x128xbf16> to vector<128x128xbf16>
    %cst_18 = arith.constant dense<0.000000e+00> : vector<64x128xf32>
    %30 = tpu.matmul %27, %29, %cst_18 {dimension_numbers = #tpu.dot_dimension_numbers<[1], [0], [0], [1], [0, 0, 1, 1], [], []>} : vector<64x128xbf16>, vector<128x128xbf16>, vector<64x128xf32> -> vector<64x128xf32>
    %c0_19 = arith.constant 0 : index
    %c0_20 = arith.constant 0 : index
    %c0_21 = arith.constant 0 : index
    %31 = vector.load %arg7[%c0_19, %c0_20, %c0_21] : memref<1x1x128xf32, #tpu.memory_space<vmem>>, vector<1x1x128xf32>
    %32 = vector.shape_cast %31 : vector<1x1x128xf32> to vector<1x128xf32>
    %33 = vector.broadcast %32 : vector<1x128xf32> to vector<64x128xf32>
    %34 = arith.addf %30, %33 : vector<64x128xf32>
    %cst_22 = arith.constant 5.000000e-01 : f32
    %35 = vector.broadcast %cst_22 : f32 to vector<64x128xf32>
    %36 = arith.mulf %35, %34 : vector<64x128xf32>
    %cst_23 = arith.constant 0.707106769 : f32
    %37 = vector.broadcast %cst_23 : f32 to vector<64x128xf32>
    %38 = arith.mulf %34, %37 : vector<64x128xf32>
    %39 = math.erf %38 : vector<64x128xf32>
    %cst_24 = arith.constant 1.000000e+00 : f32
    %40 = vector.broadcast %cst_24 : f32 to vector<64x128xf32>
    %41 = arith.addf %40, %39 : vector<64x128xf32>
    %42 = arith.mulf %36, %41 : vector<64x128xf32>
    %43 = arith.truncf %42 : vector<64x128xf32> to vector<64x128xbf16>
    %c0_25 = arith.constant 0 : index
    %c0_26 = arith.constant 0 : index
    %c0_27 = arith.constant 0 : index
    %44 = vector.load %arg8[%c0_25, %c0_26, %c0_27] : memref<1x128x128xbf16, #tpu.memory_space<vmem>>, vector<1x128x128xbf16>
    %45 = vector.shape_cast %44 : vector<1x128x128xbf16> to vector<128x128xbf16>
    %cst_28 = arith.constant dense<0.000000e+00> : vector<64x128xf32>
    %46 = tpu.matmul %43, %45, %cst_28 {dimension_numbers = #tpu.dot_dimension_numbers<[1], [0], [0], [1], [0, 0, 1, 1], [], []>} : vector<64x128xbf16>, vector<128x128xbf16>, vector<64x128xf32> -> vector<64x128xf32>
    %c0_29 = arith.constant 0 : index
    %c0_30 = arith.constant 0 : index
    %c0_31 = arith.constant 0 : index
    %47 = vector.load %arg9[%c0_29, %c0_30, %c0_31] : memref<1x1x128xf32, #tpu.memory_space<vmem>>, vector<1x1x128xf32>
    %48 = vector.shape_cast %47 : vector<1x1x128xf32> to vector<1x128xf32>
    %49 = vector.broadcast %48 : vector<1x128xf32> to vector<64x128xf32>
    %50 = arith.addf %46, %49 : vector<64x128xf32>
    %c0_32 = arith.constant 0 : index
    %c0_33 = arith.constant 0 : index
    %51 = vector.load %arg10[%c0_32, %c0_33] : memref<64x128xf32, #tpu.memory_space<vmem>>, vector<64x128xf32>
    %52 = vector.broadcast %10 : vector<64x1xf32> to vector<64x128xf32>
    %53 = arith.mulf %52, %50 : vector<64x128xf32>
    %54 = arith.addf %51, %53 : vector<64x128xf32>
    %c0_34 = arith.constant 0 : index
    %c0_35 = arith.constant 0 : index
    %55 = vector.load %arg10[%c0_34, %c0_35] : memref<64x128xf32, #tpu.memory_space<vmem>>, vector<64x128xf32>
    tpu.vector_store %arg10[%c0_34, %c0_35], %54 {strides = array<i32>} : memref<64x128xf32, #tpu.memory_space<vmem>>, vector<64x128xf32>,
    return
  }
  func.func @transform_0(%arg0: i32, %arg1: i32) -> (i32, i32) {
    %c0_i32 = arith.constant 0 : i32
    %c0_i32_0 = arith.constant 0 : i32
    return %arg0, %c0_i32 : i32, i32
  }
  func.func @transform_1(%arg0: i32, %arg1: i32) -> (i32, i32) {
    %c0_i32 = arith.constant 0 : i32
    %c0_i32_0 = arith.constant 0 : i32
    return %arg0, %c0_i32 : i32, i32
  }
  func.func @transform_2(%arg0: i32, %arg1: i32) -> (i32, i32, i32) {
    %c0_i32 = arith.constant 0 : i32
    %c0_i32_0 = arith.constant 0 : i32
    %c0_i32_1 = arith.constant 0 : i32
    return %arg1, %c0_i32, %c0_i32_0 : i32, i32, i32
  }
  func.func @transform_3(%arg0: i32, %arg1: i32) -> (i32, i32, i32) {
    %c0_i32 = arith.constant 0 : i32
    %c0_i32_0 = arith.constant 0 : i32
    %c0_i32_1 = arith.constant 0 : i32
    return %arg1, %c0_i32, %c0_i32_0 : i32, i32, i32
  }
  func.func @transform_4(%arg0: i32, %arg1: i32) -> (i32, i32, i32) {
    %c0_i32 = arith.constant 0 : i32
    %c0_i32_0 = arith.constant 0 : i32
    %c0_i32_1 = arith.constant 0 : i32
    return %arg1, %c0_i32, %c0_i32_0 : i32, i32, i32
  }
  func.func @transform_5(%arg0: i32, %arg1: i32) -> (i32, i32, i32) {
    %c0_i32 = arith.constant 0 : i32
    %c0_i32_0 = arith.constant 0 : i32
    %c0_i32_1 = arith.constant 0 : i32
    return %arg1, %c0_i32, %c0_i32_0 : i32, i32, i32
  }
  func.func @transform_6(%arg0: i32, %arg1: i32) -> (i32, i32, i32) {
    %c0_i32 = arith.constant 0 : i32
    %c0_i32_0 = arith.constant 0 : i32
    %c0_i32_1 = arith.constant 0 : i32
    return %arg1, %c0_i32, %c0_i32_0 : i32, i32, i32
  }
  func.func @transform_7(%arg0: i32, %arg1: i32) -> (i32, i32, i32) {
    %c0_i32 = arith.constant 0 : i32
    %c0_i32_0 = arith.constant 0 : i32
    %c0_i32_1 = arith.constant 0 : i32
    return %arg1, %c0_i32, %c0_i32_0 : i32, i32, i32
  }
  func.func @transform_8(%arg0: i32, %arg1: i32) -> (i32, i32) {
    %c0_i32 = arith.constant 0 : i32
    %c0_i32_0 = arith.constant 0 : i32
    return %arg0, %c0_i32 : i32, i32
  }
}

</mosaic_0001>

<bundles_post_ra>
// kernel: tpu_custom_call.1
= control target key start
LH: loop header
LB: loop body
LE: loop exit
PB: predicated region body
PF: predicated region fallthrough
CT: control target
= control target key end

     0   :  { %s2209_s0 = inlined_call_operand.vmem [shape: bf16[64,128], index: 0, kind: input, shape index: {}]   ;;  %s2210_s1 = inlined_call_operand.vmem [shape: f32[64,4], index: 1, kind: input, shape index: {}]   ;;  %s2211_s2 = inlined_call_operand.hbm [shape: bf16[4,128,128], index: 2, kind: input, shape index: {}]   ;;  %s2212_s3 = inlined_call_operand.vmem [shape: f32[4,1,128], index: 3, kind: input, shape index: {}]   ;;  %s2213_s4 = inlined_call_operand.hbm [shape: bf16[4,128,128], index: 4, kind: input, shape index: {}]   ;;  %s2214_s5 = inlined_call_operand.vmem [shape: f32[4,1,128], index: 5, kind: input, shape index: {}]   ;;  %s2215_s6 = inlined_call_operand.hbm [shape: bf16[4,128,128], index: 6, kind: input, shape index: {}]   ;;  %s2216_s7 = inlined_call_operand.vmem [shape: f32[4,1,128], index: 7, kind: input, shape index: {}]   ;;  %s2217_s8 = inlined_call_operand.hbm [shape: f32[64,128], index: 8, kind: output, shape index: {}]  }
   0x1   :  { %2226 = sst [smem:[#allocation15_spill]] %s2211_s2 }
   0x2   :  { %2227 = sst [smem:[#allocation16_spill]] %s2213_s4 }
   0x3   :  { %13 = vsyncpa [#allocation3], 0 }
   0x4   :  { %15 = vsyncpa [#allocation3 + $0x1], 0 }
   0x5   :  { %16 = vsyncpa [#allocation6], 0 }
   0x6   :  { %18 = vsyncpa [#allocation6 + $0x1], 0 }
   0x7   :  { %19 = vsyncpa [#allocation4], 0  ;;  %s1832_s27 = smov 0   ;;  %s1834_s28 = smov 0  }
   0x8   :  { %s1836_s29 = smov 0   ;;  %s1838_s30 = smov 0  }
   0x9   :  { %s1840_s9 = smov 0   ;;  %s1842_s10 = smov 0  }
   0xa LB: > { %2228 = sst [smem:[#allocation12_spill]] %s1772_s9  ;;  %s1861_s11 = sadd.s32 4294967295, %s1776_s10   ;;  %s1776_s10 = sphi %s1842_s10, %s25_s10   ;;  %s1772_s9 = sphi %s1840_s9, %s2247_s9   ;;  %s1768_s30 = sphi %s1838_s30, %s2246_s30   ;;  %s1764_s29 = sphi %s1836_s29, %s2250_s29   ;;  %s1760_s28 = sphi %s1834_s28, %s2249_s28   ;;  %s1756_s27 = sphi %s1832_s27, %s2248_s27  }
   0xb   : > { %s34_s12 = sadd.s32 1, %s1772_s9  ;;  %s96_s13 = sadd.s32 1, %s1764_s29 }
   0xc   : > { %p35_p0 = scmp.ge.s32.totalorder %s34_s12, 4  ;;  %p103_p1 = scmp.ne.s32.totalorder %s1764_s29, %s1760_s28 }
   0xd   : > { %p104_p2 = scmp.eq.s32.totalorder %s1776_s10, 0  ;;  %p109_p4 = scmp.ne.s32.totalorder %s1760_s28, %s1756_s27 }
   0xe   : > { %s2252_s12 = smov (%p35_p0, %s34_s12), 0  ;;  %p110_p5 = scmp.eq.s32.totalorder %s1861_s11, 0 }
   0xf   : > { %2229 = sst [smem:[#allocation13_spill]] %s2252_s12  ;;  %p105_p3 = por %p104_p2, %p103_p1 }
  0x10   : > { %s93_s14 = ssub.s32 %s1772_s9, %s2252_s12  ;;  %p1874_p7 = por %p110_p5, %p109_p4 }
  0x11   : > { %p94_p6 = scmp.eq.s32.totalorder %s93_s14, 0  ;;  %p1485_p8 = scmp.lt.s32.totalorder %s1776_s10, 4 }
  0x12   : > { %s2230_s15 = scalar_select %p1874_p7, 1, 0 }
  0x13   : > { %s1880_s16 = scalar_select %p94_p6, %s1764_s29, %s96_s13  }
  0x14   : > { %s2218_s17 = sand.u32 1, %s1764_s29   ;;  %s1884_s18 = sshll.u32 %s1772_s9, 10 }
  0x15   : > { %2231 = sst [smem:[#allocation14_spill]] %s1880_s16  ;;  %s1888_s19 = sshll.u32 %s2218_s17, 6 }
  0x16   : > { %p1890_p9 = pnand %p1485_p8, %p105_p3  ;;  %s334_s21 = sand.u32 1, %s1776_s10  }
  0x17   : > { %s2233_s4 = sld [smem:[#allocation16_spill]]  ;;  %s338_s25 = scalar_lea.vmem [#allocation5], %s1888_s19 }
  0x18   : > { %s345_s26 = sshll.u32 %s338_s25, 4  ;;  %s1905_s27 = scalar_lea.sflag [#allocation6], %s334_s21  ;;  %s1902_s26 = int_to_ptr.vmem [resolvable:$true] %s345_s26 }
  0x19   : > { %p1911_p12 = pneg %p1890_p9 }
  0x1d   : > { %s1899_s24 = scalar_lea.hbm %s2233_s4, %s1884_s18  ;;  %s1607_s25 = scalar_lea.hbm %s2233_s4, 4096 }
  0x1e   : > { %s1602_s13 = scalar_lea.hbm %s1899_s24, 1024  ;;  %p1608_p1 = scmp.lt.u32.totalorder %s1899_s24, %s2233_s4 }
  0x1f   : > { %p1603_p11 = scmp.ne.s32.totalorder %s1899_s24, %s1602_s13  ;;  %p1609_p2 = scmp.lt.u32.totalorder %s1607_s25, %s1602_s13 }
  0x20   : > { %p1611_p4 = scmp.lt.u32.totalorder %s1602_s13, %s1899_s24 }
  0x21   : > { %p1605_p13 = pnand %p1911_p12, %p1603_p11  ;;  %p1610_p3 = por %p1609_p2, %p1608_p1 }
  0x23   : > { %p1606_p0 = pneg %p1605_p13  ;;  %p1612_p5 = por %p1611_p4, %p1610_p3 }
  0x25   : > { %p1613_p6 = pnand %p1612_p5, %p1606_p0 }
  0x27   : > { %1616 = shalt.err (!%p1613_p6)
}
  0x28   : > { %s1617_s21 = scalar_lea.vmem %s1902_s26, 1024  ;;  %s1778_s22 = smov [#allocation5]  }
  0x29   : > { %p1618_p8 = scmp.ne.s32.totalorder %s1902_s26, %s1617_s21  ;;  %s1622_s23 = sshll.u32 %s1778_s22, 4  ;;  %s1623_s23 = int_to_ptr.vmem [resolvable:$false] %s1622_s23 }
  0x2a   : > { %s1624_s12 = scalar_lea.vmem %s1623_s23, 2048  ;;  %p1625_p10 = scmp.lt.s32.totalorder %s1902_s26, %s1623_s23 }
  0x2b   : > { %p1620_p11 = pnand %p1618_p8, %p1911_p12  ;;  %p1626_p7 = scmp.lt.s32.totalorder %s1624_s12, %s1617_s21 }
  0x2d   : > { %p1621_p13 = pneg %p1620_p11  ;;  %p1627_p1 = por %p1626_p7, %p1625_p10 }
  0x2f   : > { %p1628_p2 = pnand %p1627_p1, %p1621_p13 }
  0x31   : > { %1631 = shalt.err (!%p1628_p2)
}
  0x32   : > { %s2221_s17 = smov 64   ;;  %s2223_s13 = smov 4  }
  0x33   : > { %1481 = dma.hbm_to_vmem [thread:$0]  (!%p1890_p9), %s1899_s24, 1024, %s1902_s26, %s1905_s27, %s2221_s17, %s2221_s17, %s2223_s13  }
  0x34   : > { %p386_p7 = scmp.lt.s32.totalorder %s1776_s10, 5  ;;  %p2235_p10 = scmp.ge.s32.totalorder %s1776_s10, 1 }
  0x35   : > { %s2237_s2 = sld [smem:[#allocation15_spill]]  ;;  %s311_s12 = scalar_lea.vmem [#allocation2], %s1888_s19 }
  0x36   : > { %p1941_p0 = pnand %p2235_p10, %p386_p7  ;;  %s318_s4 = sshll.u32 %s311_s12, 4  ;;  %s1952_s4 = int_to_ptr.vmem [resolvable:$true] %s318_s4 }
  0x37   : > { %s2238_s24 = sand.u32 1, %s1764_s29  }
  0x38   : > { %s2236_s25 = scalar_select %p1941_p0, 1, 0 }
  0x39   : > { %s1956_s26 = scalar_lea.sflag [#allocation3], %s2238_s24 }
  0x3b   : > { %s1949_s23 = scalar_lea.hbm %s2237_s2, %s1884_s18  ;;  %s1637_s22 = scalar_lea.hbm %s2237_s2, 4096 }
  0x3c   : > { %s1632_s17 = scalar_lea.hbm %s1949_s23, 1024  ;;  %p1638_p6 = scmp.lt.u32.totalorder %s1949_s23, %s2237_s2 }
  0x3d   : > { %p1633_p3 = scmp.ne.s32.totalorder %s1949_s23, %s1632_s17  ;;  %p1639_p8 = scmp.lt.u32.totalorder %s1637_s22, %s1632_s17 }
  0x3e   : > { %p1641_p13 = scmp.lt.u32.totalorder %s1632_s17, %s1949_s23 }
  0x3f   : > { %p1635_p4 = pnand %p1633_p3, %p1911_p12  ;;  %p1640_p11 = por %p1639_p8, %p1638_p6 }
  0x41   : > { %p1636_p5 = pneg %p1635_p4  ;;  %p1642_p1 = por %p1641_p13, %p1640_p11 }
  0x43   : > { %p1643_p2 = pnand %p1642_p1, %p1636_p5 }
  0x45   : > { %1646 = shalt.err (!%p1643_p2)
}
  0x46   : > { %s1647_s12 = scalar_lea.vmem %s1952_s4, 1024  ;;  %s1781_s13 = smov [#allocation2]  }
  0x47   : > { %p1648_p7 = scmp.ne.s32.totalorder %s1952_s4, %s1647_s12  ;;  %s1652_s24 = sshll.u32 %s1781_s13, 4  ;;  %s1653_s24 = int_to_ptr.vmem [resolvable:$false] %s1652_s24 }
  0x48   : > { %s1654_s9 = scalar_lea.vmem %s1653_s24, 2048  ;;  %p1655_p4 = scmp.lt.s32.totalorder %s1952_s4, %s1653_s24 }
  0x49   : > { %p1650_p10 = pnand %p1648_p7, %p1911_p12  ;;  %p1656_p0 = scmp.lt.s32.totalorder %s1654_s9, %s1647_s12 }
  0x4b   : > { %p1651_p3 = pneg %p1650_p10  ;;  %p1657_p6 = por %p1656_p0, %p1655_p4 }
  0x4d   : > { %p1658_p8 = pnand %p1657_p6, %p1651_p3 }
  0x4f   : > { %1661 = shalt.err (!%p1658_p8)
}
  0x50   : > { %s2239_s16 = smov 4   ;;  %s2240_s17 = smov 64  }
  0x51   : > { %1478 = dma.hbm_to_vmem [thread:$0]  (!%p1890_p9), %s1949_s23, 1024, %s1952_s4, %s1956_s26, %s2240_s17, %s2240_s17, %s2239_s16  }
  0x52   : > { %s1987_s13 = scalar_lea.hbm %s2215_s6, %s1884_s18  ;;  %s365_s12 = scalar_lea.vmem [#allocation7], %s1888_s19 }
  0x53   : > { %s372_s24 = sshll.u32 %s365_s12, 4  ;;  %s1662_s9 = scalar_lea.hbm %s1987_s13, 1024  ;;  %s1990_s24 = int_to_ptr.vmem [resolvable:$true] %s372_s24 }
  0x54   : > { %p1663_p0 = scmp.ne.s32.totalorder %s1987_s13, %s1662_s9  ;;  %s1667_s23 = scalar_lea.hbm %s2215_s6, 4096 }
  0x55   : > { %p1668_p13 = scmp.lt.u32.totalorder %s1987_s13, %s2215_s6  ;;  %p1669_p1 = scmp.lt.u32.totalorder %s1667_s23, %s1662_s9 }
  0x56   : > { %p1665_p5 = pnand %p1663_p0, %p1911_p12  ;;  %p1671_p7 = scmp.lt.u32.totalorder %s1662_s9, %s1987_s13 }
  0x57   : > { %p1670_p2 = por %p1669_p1, %p1668_p13 }
  0x58   : > { %p1666_p11 = pneg %p1665_p5 }
  0x59   : > { %p1672_p10 = por %p1671_p7, %p1670_p2 }
  0x5b   : > { %p1673_p3 = pnand %p1672_p10, %p1666_p11 }
  0x5d   : > { %1676 = shalt.err (!%p1673_p3)
}
  0x5e   : > { %s1677_s19 = scalar_lea.vmem %s1990_s24, 1024  ;;  %s1782_s2 = smov [#allocation7]  }
  0x5f   : > { %p1678_p4 = scmp.ne.s32.totalorder %s1990_s24, %s1677_s19  ;;  %s1682_s21 = sshll.u32 %s1782_s2, 4  ;;  %s1683_s21 = int_to_ptr.vmem [resolvable:$false] %s1682_s21 }
  0x60   : > { %s1684_s22 = scalar_lea.vmem %s1683_s21, 2048  ;;  %p1685_p0 = scmp.lt.s32.totalorder %s1990_s24, %s1683_s21 }
  0x61   : > { %p1680_p6 = pnand %p1678_p4, %p1911_p12  ;;  %p1686_p5 = scmp.lt.s32.totalorder %s1684_s22, %s1677_s19 }
  0x63   : > { %p1681_p8 = pneg %p1680_p6  ;;  %p1687_p13 = por %p1686_p5, %p1685_p0 }
  0x65   : > { %p1688_p1 = pnand %p1687_p13, %p1681_p8 }
  0x67   : > { %1691 = shalt.err (!%p1688_p1)
}
  0x68   : > { %1484 = dma.hbm_to_vmem [thread:$0]  (!%p1890_p9), %s1987_s13, 1024, %s1990_s24, %s1905_s27, %s2240_s17, %s2240_s17, %s2239_s16  }
  0x69   : > { %p2241_p12 = scmp.ne.s32.totalorder %s2236_s25, 0 }
  0x6a   : > { %s392_s14 = sand.u32 (!%p2241_p12), 1, %s1760_s28   ;;  %p2242_p11 = scmp.ne.s32.totalorder (!%p2241_p12), %s2230_s15, 0 }
  0x6b   : > { %390 = sbr.rel (%p2241_p12) target bundleno = 880 (0x370), region = 52  ;;  %s1299_s12 = sshll.u32 (!%p2241_p12), %s392_s14, 6 }
  0x6c   : > { %s393_s9 = scalar_lea.sflag (!%p2241_p12), [#allocation3], %s392_s14  ;;  %s2020_s4 = scalar_lea.vmem (!%p2241_p12), [#allocation2], %s1299_s12 }
  0x72   : > { %1743 = dma.done.wait (%p2242_p11), %s393_s9, 1024  }
  0x73   : > { %1745 = vsyncadd (%p2242_p11), %s393_s9, 4294966272  ;;  %s401_s20 = sand.u32 1, %s1861_s11   ;;  %s2027_s27 = scalar_lea.vmem [#allocation5], %s1299_s12 }
  0x74   : > { %s402_s23 = scalar_lea.sflag [#allocation6], %s401_s20 }
  0x75   : > { %1747 = dma.done.wait (%p2242_p11), %s402_s23, 2048  }
  0x76   : > { %1749 = vsyncadd (%p2242_p11), %s402_s23, 4294965248  ;;  %p483_p9 = scmp.lt.s32.totalorder %s1768_s30, 3  ;;  %s2049_s21 = scalar_lea.vmem [#allocation7], %s1299_s12 }
  0x77   : > { %p1302_p2 = scmp.ne.s32.totalorder %s1768_s30, 0 }
  0x78   : > { %s2035_s25 = scalar_select %p483_p9, %s1768_s30, 3 }
  0x79   : > { %497 = sbr.rel (%p1302_p2) target bundleno = 128 (0x80), region = 68  ;;  %v1783_v0 = vmov (!%p1302_p2), 0.0  }
  0x7a   : > { %s485_s13 = scalar_lea.vmem %s2212_s3, %s2035_s25  ;;  %s488_s18 = scalar_lea.vmem %s2214_s5, %s2035_s25  ;;  %498 = vst [vmem:[#allocation8] sm:$0xff] (!%p1302_p2), %v1783_v0  ;;  %499 = vst [vmem:[#allocation8 + $0x8] sm:$0xff] (!%p1302_p2), %v1783_v0 }
  0x7b   : > { %s491_s15 = scalar_lea.vmem %s2216_s7, %s2035_s25  ;;  %500 = vst [vmem:[#allocation8 + $0x10] sm:$0xff] (!%p1302_p2), %v1783_v0  ;;  %501 = vst [vmem:[#allocation8 + $0x18] sm:$0xff] (!%p1302_p2), %v1783_v0 }
  0x7c   : > { %502 = vst [vmem:[#allocation8 + $0x20] sm:$0xff] (!%p1302_p2), %v1783_v0  ;;  %503 = vst [vmem:[#allocation8 + $0x28] sm:$0xff] (!%p1302_p2), %v1783_v0 }
  0x7d   : > { %504 = vst [vmem:[#allocation8 + $0x30] sm:$0xff] (!%p1302_p2), %v1783_v0  ;;  %505 = vst [vmem:[#allocation8 + $0x38] sm:$0xff] (!%p1302_p2), %v1783_v0 }
  0x80 PF: > { %v1542_v1 = vld [vmem:[%s2020_s4] sm:$0xff]   ;;  %v1543_v2 = vld [vmem:[%s2020_s4 + $0x8] sm:$0xff]   ;;  %v1544_v3 = vld [vmem:[%s2020_s4 + $0x10] sm:$0xff]   ;;  %vm526_vm0 = vcmask 31744   ;;  %s1784_s25 = smov [#allocation8]   ;;  %p1486_p7 = scmp.eq.s32.totalorder %s1861_s11, 3 }
  0x81   : > { %1377 = vmatprep.subr.bf16.mxu0 %v1542_v1  ;;  %v1545_v4 = vld [vmem:[%s2020_s4 + $0x18] sm:$0xff]   ;;  %v1550_v5 = vld [vmem:[%s2209_s0] sm:$0xff]   ;;  %v1555_v8 = vld [vmem:[%s2027_s27 + $0x8] sm:$0xff]  }
  0x82   : > { %1378 = vmatpush3.bf16.msra.mxu0 %v1542_v1  ;;  %1393 = vmatprep.mubr.bf16.mxu0 %v1550_v5  ;;  %v1546_v6 = vld [vmem:[%s2020_s4 + $0x20] sm:$0xff]   ;;  %v1547_v9 = vld [vmem:[%s2020_s4 + $0x28] sm:$0xff]   ;;  %v1548_v10 = vld [vmem:[%s2020_s4 + $0x30] sm:$0xff]  }
  0x83   : > { %1379 = vmatprep.subr.bf16.mxu0 %v1543_v2  ;;  %v1554_v7 = vld [vmem:[%s2027_s27] sm:$0xff]   ;;  %v1549_v11 = vld [vmem:[%s2020_s4 + $0x38] sm:$0xff]   ;;  %v1551_v12 = vld [vmem:[%s2209_s0 + $0x8] sm:$0xff]  }
  0x84   : > { %1401 = vmatprep.subr.bf16.mxu1 %v1554_v7  ;;  %v1552_v13 = vld [vmem:[%s2209_s0 + $0x10] sm:$0xff]   ;;  %v1553_v14 = vld [vmem:[%s2209_s0 + $0x18] sm:$0xff]   ;;  %v1558_v17 = vld [vmem:[%s2027_s27 + $0x20] sm:$0xff]  }
  0x85   : > { %1402 = vmatpush3.bf16.msra.mxu1 %v1554_v7  ;;  %v1556_v15 = vld [vmem:[%s2027_s27 + $0x10] sm:$0xff]   ;;  %v1557_v16 = vld [vmem:[%s2027_s27 + $0x18] sm:$0xff]   ;;  %v1559_v18 = vld [vmem:[%s2027_s27 + $0x28] sm:$0xff]  }
  0x86   : > { %1380 = vmatpush3.bf16.msra.mxu0 %v1543_v2  ;;  %1403 = vmatprep.subr.bf16.mxu1 %v1555_v8  ;;  %v1560_v19 = vld [vmem:[%s2027_s27 + $0x30] sm:$0xff]   ;;  %v1561_v20 = vld [vmem:[%s2027_s27 + $0x38] sm:$0xff]   ;;  %v2081_v21 = vld [vmem:[%s2049_s21] sm:$0xff]  }
  0x87   : > { %1381 = vmatprep.subr.bf16.mxu0 %v1544_v3  ;;  %v2084_v22 = vld [vmem:[%s2049_s21 + $0x8] sm:$0xff]   ;;  %v1303_v23 = vld [vmem:[%s485_s13] ss:$0 sm:$0xff] }
  0x89   : > { %1404 = vmatpush3.bf16.msra.mxu1 %v1555_v8 }
  0x8a   : > { %1382 = vmatpush3.bf16.msra.mxu0 %v1544_v3  ;;  %1405 = vmatprep.subr.bf16.mxu1 %v1556_v15 }
  0x8b   : > { %1383 = vmatprep.subr.bf16.mxu0 %v1545_v4 }
  0x8d   : > { %1406 = vmatpush3.bf16.msra.mxu1 %v1556_v15 }
  0x8e   : > { %1384 = vmatpush3.bf16.msra.mxu0 %v1545_v4  ;;  %1407 = vmatprep.subr.bf16.mxu1 %v1557_v16 }
  0x8f   : > { %1385 = vmatprep.subr.bf16.mxu0 %v1546_v6 }
  0x91   : > { %1408 = vmatpush3.bf16.msra.mxu1 %v1557_v16 }
  0x92   : > { %1386 = vmatpush3.bf16.msra.mxu0 %v1546_v6  ;;  %1409 = vmatprep.subr.bf16.mxu1 %v1558_v17 }
  0x93   : > { %1387 = vmatprep.subr.bf16.mxu0 %v1547_v9 }
  0x95   : > { %1410 = vmatpush3.bf16.msra.mxu1 %v1558_v17 }
  0x96   : > { %1388 = vmatpush3.bf16.msra.mxu0 %v1547_v9  ;;  %1411 = vmatprep.subr.bf16.mxu1 %v1559_v18 }
  0x97   : > { %1389 = vmatprep.subr.bf16.mxu0 %v1548_v10 }
  0x99   : > { %1412 = vmatpush3.bf16.msra.mxu1 %v1559_v18 }
  0x9a   : > { %1390 = vmatpush3.bf16.msra.mxu0 %v1548_v10  ;;  %1413 = vmatprep.subr.bf16.mxu1 %v1560_v19 }
  0x9b   : > { %1391 = vmatprep.subr.bf16.mxu0 %v1549_v11 }
  0x9d   : > { %1414 = vmatpush3.bf16.msra.mxu1 %v1560_v19 }
  0x9e   : > { %1392 = vmatpush3.bf16.msra.mxu0 %v1549_v11  ;;  %1415 = vmatprep.subr.bf16.mxu1 %v1561_v20 }
  0x9f   : > { %1425 = vmatprep.subr.bf16.mxu0 %v2081_v21 }
  0xa1   : > { %1394 = vmatmul.mubr.bf16.vlgmr.msra.gmra.mrb[0].mxu0 %v1551_v12  ;;  %1416 = vmatpush3.bf16.msra.mxu1 %v1561_v20  ;;  %v1564_v20 = vld [vmem:[%s2049_s21 + $0x10] sm:$0xff]  }
  0xa2   : > { %1397 = vmatprep.mubr.bf16.mxu0 %v1552_v13  ;;  %1449 = vmatprep.subr.bf16.mxu1 %v2081_v21 }
  0xa3   : > { %1426 = vmatpush3.bf16.msra.mxu0 %v2081_v21 }
  0xa4   : > { %1427 = vmatprep.subr.bf16.mxu0 %v2084_v22 }
  0xa7   : > { %1428 = vmatpush3.bf16.msra.mxu0 %v2084_v22 }
  0xa8   : > { %1429 = vmatprep.subr.bf16.mxu0 %v1564_v20 }
  0xa9   : > { %1398 = vmatmul.mubr.bf16.gmra.mrb[4].mxu0 %v1553_v14 }
  0xab   : > { %1430 = vmatpush3.bf16.msra.mxu0 %v1564_v20 }
 0x174   : > { %v1395_v24 = vpop.f32.mrb[0].mxu0 }
 0x175   : > { %v697_v25 = vadd.f32 %v1395_v24, %v1303_v23  ;;  %v688_v26 = vpop.f32.mrb[1].mxu0  ;;  %v1568_v24 = vld [vmem:[%s2049_s21 + $0x30] sm:$0xff]  }
 0x176   : > { %v689_v27 = vadd.f32 %v1303_v23, %v688_v26  ;;  %v1396_v28 = vpop.f32.mrb[2].mxu0  ;;  %v514_v26 = vlaneseq }
 0x177   : > { %v729_v29 = vmul.f32 0.70710677, %v697_v25  ;;  %v700_v30 = vadd.f32 %v1396_v28, %v1303_v23  ;;  %v691_v31 = vpop.f32.mrb[3].mxu0  ;;  %v721_v54 = vmul.f32 0.5, %v697_v25  ;;  %v1569_v25 = vld [vmem:[%s2049_s21 + $0x38] sm:$0xff]   ;;  %v516_v28 = vstv %s1768_s30 }
 0x178   : > { %v727_v32 = vmul.f32 0.70710677, %v689_v27  ;;  %v692_v33 = vadd.f32 %v1303_v23, %v691_v31  ;;  %v719_v57 = vmul.f32 0.5, %v689_v27  ;;  %v506_v27 = vld [vmem:[%s2210_s1] sm:$0xff]  ;;  %v507_v31 = vld [vmem:[%s2210_s1 + $0x8] sm:$0xff] }
 0x179   : > { %1570 = verf.f32 %v729_v29  ;;  %v730_v34 = vmul.f32 0.70710677, %v700_v30  ;;  %v722_v55 = vmul.f32 0.5, %v700_v30  ;;  %v515_v29 = vand.u32 127, %v514_v26  ;;  %v508_v30 = vld [vmem:[%s2210_s1 + $0x10] sm:$0xff] }
 0x17a   : > { %1572 = verf.f32 %v727_v32  ;;  %v728_v35 = vmul.f32 0.70710677, %v692_v33  ;;  %v720_v58 = vmul.f32 0.5, %v692_v33  ;;  %v509_v32 = vld [vmem:[%s2210_s1 + $0x18] sm:$0xff] }
 0x17b   : > { %1574 = verf.f32 %v730_v34  ;;  %vm2118_vm1 = vcmp.eq.s32.totalorder %v515_v29, %v516_v28 }
 0x17c   : > { %1576 = verf.f32 %v728_v35  ;;  %v1399_v36 = vpop.f32.mrb[4].mxu0  ;;  %v518_v34 = vsel %vm2118_vm1, %v506_v27, 0.0  ;;  %v520_v35 = vsel %vm2118_vm1, %v508_v30, 0.0 }
 0x17d   : > { %v713_v37 = vadd.f32 %v1399_v36, %v1303_v23  ;;  %v704_v38 = vpop.f32.mrb[5].mxu0  ;;  %v519_v36 = vsel %vm2118_vm1, %v507_v31, 0.0 }
 0x17e   : > { %v705_v39 = vadd.f32 %v1303_v23, %v704_v38  ;;  %v1400_v40 = vpop.f32.mrb[6].mxu0  ;;  %v527_v38 = vsel %vm526_vm0, %v518_v34, 0.0 }
 0x17f   : > { %v733_v41 = vmul.f32 0.70710677, %v713_v37  ;;  %v716_v42 = vadd.f32 %v1400_v40, %v1303_v23  ;;  %v707_v43 = vpop.f32.mrb[7].mxu0  ;;  %v725_v8 = vmul.f32 0.5, %v713_v37  ;;  %v521_v37 = vsel %vm2118_vm1, %v509_v32, 0.0  ;;  %v510_v40 = vld [vmem:[%s2210_s1 + $0x20] sm:$0xff]  ;;  %528 = vadd.xlane.f32.xlu0 %v527_v38 }
 0x180   : > { %v731_v44 = vmul.f32 0.70710677, %v705_v39  ;;  %v708_v45 = vadd.f32 %v1303_v23, %v707_v43  ;;  %v723_v11 = vmul.f32 0.5, %v705_v39  ;;  %v1566_v23 = vld [vmem:[%s2049_s21 + $0x20] sm:$0xff]   ;;  %v533_v39 = vsel %vm526_vm0, %v520_v35, 0.0 }
 0x181   : > { %1578 = verf.f32 %v733_v41  ;;  %v734_v46 = vmul.f32 0.70710677, %v716_v42  ;;  %v726_v9 = vmul.f32 0.5, %v716_v42  ;;  %v511_v41 = vld [vmem:[%s2210_s1 + $0x28] sm:$0xff]  ;;  %534 = vadd.xlane.f32.xlu1 %v533_v39  ;;  %v530_v42 = vsel %vm526_vm0, %v519_v36, 0.0 }
 0x182   : > { %1580 = verf.f32 %v731_v44  ;;  %v732_v47 = vmul.f32 0.70710677, %v708_v45  ;;  %v724_v12 = vmul.f32 0.5, %v708_v45  ;;  %v536_v43 = vsel %vm526_vm0, %v521_v37, 0.0 }
 0x183   : > { %v1571_v48 = vpop.eup %1570  ;;  %1582 = verf.f32 %v734_v46  ;;  %v522_v44 = vsel %vm2118_vm1, %v510_v40, 0.0  ;;  %v523_v45 = vsel %vm2118_vm1, %v511_v41, 0.0  ;;  %v512_v46 = vld [vmem:[%s2210_s1 + $0x30] sm:$0xff]  ;;  %531 = vadd.xlane.f32.xlu0 %v530_v42 }
 0x184   : > { %v1573_v49 = vpop.eup %1572  ;;  %v745_v50 = vadd.f32 1.0, %v1571_v48  ;;  %1584 = verf.f32 %v732_v47  ;;  %v513_v47 = vld [vmem:[%s2210_s1 + $0x38] sm:$0xff]  ;;  %v539_v48 = vsel %vm526_vm0, %v522_v44, 0.0 }
 0x185   : > { %v1575_v51 = vpop.eup %1574  ;;  %v743_v52 = vadd.f32 1.0, %v1573_v49  ;;  %537 = vadd.xlane.f32.xlu1 %v536_v43  ;;  %v542_v49 = vsel %vm526_vm0, %v523_v45, 0.0 }
 0x186   : > { %v1577_v53 = vpop.eup %1576  ;;  %v746_v56 = vadd.f32 1.0, %v1575_v51  ;;  %v753_v60 = vmul.f32 %v745_v50, %v721_v54  ;;  %v524_v50 = vsel %vm2118_vm1, %v512_v46, 0.0  ;;  %v525_v51 = vsel %vm2118_vm1, %v513_v47, 0.0  ;;  %v1316_v54 = vld [vmem:[%s488_s18] ss:$0 sm:$0xff] }
 0x187   : > { %v744_v59 = vadd.f32 1.0, %v1577_v53  ;;  %v751_v62 = vmul.f32 %v743_v52, %v719_v57  ;;  %540 = vadd.xlane.f32.xlu0 %v539_v48  ;;  %v545_v52 = vsel %vm526_vm0, %v524_v50, 0.0  ;;  %v548_v53 = vsel %vm526_vm0, %v525_v51, 0.0 }
 0x188   : > { %v754_v61 = vmul.f32 %v746_v56, %v722_v55 }
 0x189   : > { %v752_v63 = vmul.f32 %v744_v59, %v720_v58  ;;  %543 = vadd.xlane.f32.xlu1 %v542_v49 }
 0x18a   : > { %v760_v0 = vpack.c.bf16 %v754_v61, %v753_v60 }
 0x18b   : > { %v1579_v1 = vpop.eup %1578  ;;  %v759_v2 = vpack.c.bf16 %v752_v63, %v751_v62  ;;  %546 = vadd.xlane.f32.xlu0 %v545_v52 }
 0x18c   : > { %v1581_v3 = vpop.eup %1580  ;;  %v749_v4 = vadd.f32 1.0, %v1579_v1 }
 0x18d   : > { %v1583_v5 = vpop.eup %1582  ;;  %v747_v6 = vadd.f32 1.0, %v1581_v3  ;;  %1417 = vmatprep.mubr.bf16.mxu1 %v759_v2  ;;  %549 = vadd.xlane.f32.xlu1 %v548_v53 }
 0x18e   : > { %v1585_v7 = vpop.eup %1584  ;;  %v750_v10 = vadd.f32 1.0, %v1583_v5  ;;  %1418 = vmatmul.mubr.bf16.vlgmr.msra.gmra.mrb[0].mxu1 %v760_v0  ;;  %v757_v14 = vmul.f32 %v749_v4, %v725_v8 }
 0x18f   : > { %v748_v13 = vadd.f32 1.0, %v1585_v7  ;;  %1457 = vmatpush3.bf16.msra.mxu1 %v2081_v21  ;;  %v755_v16 = vmul.f32 %v747_v6, %v723_v11  ;;  %v1565_v21 = vld [vmem:[%s2049_s21 + $0x18] sm:$0xff]  }
 0x190   : > { %v758_v15 = vmul.f32 %v750_v10, %v726_v9  ;;  %1450 = vmatprep.subr.bf16.mxu1 %v2084_v22  ;;  %1431 = vmatprep.subr.bf16.mxu0 %v1565_v21 }
 0x191   : > { %v756_v17 = vmul.f32 %v748_v13, %v724_v12  ;;  %1432 = vmatpush3.bf16.msra.mxu0 %v1565_v21 }
 0x192   : > { %v762_v18 = vpack.c.bf16 %v758_v15, %v757_v14  ;;  %1433 = vmatprep.subr.bf16.mxu0 %v1566_v23 }
 0x193   : > { %v761_v19 = vpack.c.bf16 %v756_v17, %v755_v16  ;;  %1458 = vmatpush3.bf16.msra.mxu1 %v2084_v22  ;;  %v1567_v22 = vld [vmem:[%s2049_s21 + $0x28] sm:$0xff]  }
 0x194   : > { %1451 = vmatprep.subr.bf16.mxu1 %v1564_v20 }
 0x195   : > { %1421 = vmatprep.mubr.bf16.mxu1 %v761_v19  ;;  %1434 = vmatpush3.bf16.msra.mxu0 %v1566_v23 }
 0x196   : > { %1422 = vmatmul.mubr.bf16.gmra.mrb[4].mxu1 %v762_v18  ;;  %1435 = vmatprep.subr.bf16.mxu0 %v1567_v22 }
 0x197   : > { %1459 = vmatpush3.bf16.msra.mxu1 %v1564_v20 }
 0x198   : > { %1452 = vmatprep.subr.bf16.mxu1 %v1565_v21 }
 0x199   : > { %1436 = vmatpush3.bf16.msra.mxu0 %v1567_v22 }
 0x19a   : > { %1437 = vmatprep.subr.bf16.mxu0 %v1568_v24 }
 0x19b   : > { %1460 = vmatpush3.bf16.msra.mxu1 %v1565_v21 }
 0x19c   : > { %1453 = vmatprep.subr.bf16.mxu1 %v1566_v23 }
 0x19d   : > { %1438 = vmatpush3.bf16.msra.mxu0 %v1568_v24 }
 0x19e   : > { %1439 = vmatprep.subr.bf16.mxu0 %v1569_v25 }
 0x19f   : > { %1461 = vmatpush3.bf16.msra.mxu1 %v1566_v23 }
 0x1a0   : > { %1454 = vmatprep.subr.bf16.mxu1 %v1567_v22 }
 0x1a1   : > { %1440 = vmatpush3.bf16.msra.mxu0 %v1569_v25 }
 0x1a3   : > { %1462 = vmatpush3.bf16.msra.mxu1 %v1567_v22 }
 0x1a4   : > { %1455 = vmatprep.subr.bf16.mxu1 %v1568_v24 }
 0x1a7   : > { %1463 = vmatpush3.bf16.msra.mxu1 %v1568_v24 }
 0x1a8   : > { %1456 = vmatprep.subr.bf16.mxu1 %v1569_v25 }
 0x1ab   : > { %1464 = vmatpush3.bf16.msra.mxu1 %v1569_v25 }
 0x20c   : > { %v529_v51 = vpop.xlane.xlu0 %528 }
 0x20e   : > { %v535_v52 = vpop.xlane.xlu1 %534 }
 0x210   : > { %v532_v53 = vpop.xlane.xlu0 %531 }
 0x261   : > { %v1419_v55 = vpop.f32.mrb[0].mxu1 }
 0x262   : > { %v877_v56 = vadd.f32 %v1419_v55, %v1316_v54  ;;  %v868_v57 = vpop.f32.mrb[1].mxu1  ;;  %v538_v55 = vpop.xlane.xlu1 %537 }
 0x263   : > { %v869_v58 = vadd.f32 %v1316_v54, %v868_v57  ;;  %v1420_v59 = vpop.f32.mrb[2].mxu1 }
 0x264   : > { %v909_v60 = vmul.f32 0.70710677, %v877_v56  ;;  %v880_v61 = vadd.f32 %v1420_v59, %v1316_v54  ;;  %v871_v62 = vpop.f32.mrb[3].mxu1  ;;  %v901_v21 = vmul.f32 0.5, %v877_v56  ;;  %v1081_v59 = vld [vmem:[#allocation8 + $0x10] sm:$0xff] }
 0x265   : > { %v907_v63 = vmul.f32 0.70710677, %v869_v58  ;;  %v872_v0 = vadd.f32 %v1316_v54, %v871_v62  ;;  %v899_v24 = vmul.f32 0.5, %v869_v58  ;;  %v541_v62 = vpop.xlane.xlu0 %540 }
 0x266   : > { %1586 = verf.f32 %v909_v60  ;;  %v910_v1 = vmul.f32 0.70710677, %v880_v61  ;;  %v902_v23 = vmul.f32 0.5, %v880_v61 }
 0x267   : > { %1588 = verf.f32 %v907_v63  ;;  %v908_v2 = vmul.f32 0.70710677, %v872_v0  ;;  %v900_v25 = vmul.f32 0.5, %v872_v0  ;;  %v1079_v0 = vld [vmem:[#allocation8] sm:$0xff] }
 0x268   : > { %1590 = verf.f32 %v910_v1 }
 0x269   : > { %1592 = verf.f32 %v908_v2  ;;  %v1423_v3 = vpop.f32.mrb[4].mxu1 }
 0x26a   : > { %v893_v4 = vadd.f32 %v1423_v3, %v1316_v54  ;;  %v884_v5 = vpop.f32.mrb[5].mxu1 }
 0x26b   : > { %v885_v6 = vadd.f32 %v1316_v54, %v884_v5  ;;  %v1424_v7 = vpop.f32.mrb[6].mxu1  ;;  %v1082_v5 = vld [vmem:[#allocation8 + $0x18] sm:$0xff] }
 0x26c   : > { %v913_v8 = vmul.f32 0.70710677, %v893_v4  ;;  %v896_v9 = vadd.f32 %v1424_v7, %v1316_v54  ;;  %v887_v10 = vpop.f32.mrb[7].mxu1  ;;  %v905_v39 = vmul.f32 0.5, %v893_v4 }
 0x26d   : > { %v911_v11 = vmul.f32 0.70710677, %v885_v6  ;;  %v888_v12 = vadd.f32 %v1316_v54, %v887_v10  ;;  %v903_v42 = vmul.f32 0.5, %v885_v6  ;;  %v1325_v54 = vld [vmem:[%s491_s15] ss:$0 sm:$0xff]  ;;  %v544_v6 = vpop.xlane.xlu1 %543  ;;  %s1120_s15 = sshll.u32 %s1784_s25, 4  ;;  %s1121_s15 = int_to_ptr.vmem [resolvable:$true] %s1120_s15 }
 0x26e   : > { %1594 = verf.f32 %v913_v8  ;;  %v914_v13 = vmul.f32 0.70710677, %v896_v9  ;;  %v906_v40 = vmul.f32 0.5, %v896_v9  ;;  %v1080_v8 = vld [vmem:[#allocation8 + $0x8] sm:$0xff]  ;;  %s1692_s26 = scalar_lea.vmem %s1121_s15, 1024  ;;  %p1699_p6 = scmp.lt.s32.totalorder %s1121_s15, %s1121_s15 }
 0x26f   : > { %1596 = verf.f32 %v911_v11  ;;  %v912_v14 = vmul.f32 0.70710677, %v888_v12  ;;  %v904_v43 = vmul.f32 0.5, %v888_v12  ;;  %p1693_p10 = scmp.ne.s32.totalorder %s1121_s15, %s1692_s26  ;;  %p1700_p8 = scmp.lt.s32.totalorder %s1692_s26, %s1692_s26 }
 0x270   : > { %v1587_v15 = vpop.eup %1586  ;;  %1598 = verf.f32 %v914_v13 }
 0x271   : > { %v1589_v16 = vpop.eup %1588  ;;  %v925_v17 = vadd.f32 1.0, %v1587_v15  ;;  %1600 = verf.f32 %v912_v14  ;;  %v547_v15 = vpop.xlane.xlu0 %546  ;;  %p1694_p3 = pnand %p1693_p10, %p1486_p7  ;;  %p1701_p0 = por %p1700_p8, %p1699_p6 }
 0x272   : > { %v1591_v18 = vpop.eup %1590  ;;  %v923_v19 = vadd.f32 1.0, %v1589_v16 }
 0x273   : > { %v1593_v20 = vpop.eup %1592  ;;  %v926_v22 = vadd.f32 1.0, %v1591_v18  ;;  %v933_v27 = vmul.f32 %v925_v17, %v901_v21  ;;  %v550_v21 = vpop.xlane.xlu1 %549  ;;  %p1695_p4 = pneg %p1694_p3 }
 0x274   : > { %v924_v26 = vadd.f32 1.0, %v1593_v20  ;;  %v931_v29 = vmul.f32 %v923_v19, %v899_v24  ;;  %v1085_v20 = vld [vmem:[#allocation8 + $0x30] sm:$0xff] }
 0x275   : > { %v934_v28 = vmul.f32 %v926_v22, %v902_v23  ;;  %v1083_v23 = vld [vmem:[#allocation8 + $0x20] sm:$0xff]  ;;  %p1702_p5 = pnand %p1701_p0, %p1695_p4 }
 0x276   : > { %v932_v30 = vmul.f32 %v924_v26, %v900_v25 }
 0x277   : > { %v940_v31 = vpack.c.bf16 %v934_v28, %v933_v27  ;;  %v1086_v28 = vld [vmem:[#allocation8 + $0x38] sm:$0xff] }
 0x278   : > { %v1595_v32 = vpop.eup %1594  ;;  %v939_v33 = vpack.c.bf16 %v932_v30, %v931_v29  ;;  %v1084_v30 = vld [vmem:[#allocation8 + $0x28] sm:$0xff] }
 0x279   : > { %v1597_v34 = vpop.eup %1596  ;;  %v929_v35 = vadd.f32 1.0, %v1595_v32 }
 0x27a   : > { %v1599_v36 = vpop.eup %1598  ;;  %v927_v37 = vadd.f32 1.0, %v1597_v34  ;;  %1441 = vmatprep.mubr.bf16.mxu0 %v939_v33 }
 0x27b   : > { %v1601_v38 = vpop.eup %1600  ;;  %v930_v41 = vadd.f32 1.0, %v1599_v36  ;;  %1442 = vmatmul.mubr.bf16.vlgmr.msra.gmra.mrb[8].mxu0 %v940_v31  ;;  %v937_v45 = vmul.f32 %v929_v35, %v905_v39 }
 0x27c   : > { %v928_v44 = vadd.f32 1.0, %v1601_v38  ;;  %v935_v47 = vmul.f32 %v927_v37, %v903_v42 }
 0x27d   : > { %v938_v46 = vmul.f32 %v930_v41, %v906_v40 }
 0x27e   : > { %v936_v48 = vmul.f32 %v928_v44, %v904_v43 }
 0x27f   : > { %v942_v49 = vpack.c.bf16 %v938_v46, %v937_v45 }
 0x280   : > { %v941_v50 = vpack.c.bf16 %v936_v48, %v935_v47 }
 0x282   : > { %1445 = vmatprep.mubr.bf16.mxu1 %v941_v50 }
 0x283   : > { %1446 = vmatmul.mubr.bf16.vlgmr.msra.gmra.mrb[8].mxu1 %v942_v49 }
 0x34e   : > { %v1443_v56 = vpop.f32.mrb[8].mxu0 }
 0x34f   : > { %v1057_v57 = vadd.f32 %v1443_v56, %v1325_v54  ;;  %v1048_v58 = vpop.f32.mrb[9].mxu0 }
 0x350   : > { %v1049_v60 = vadd.f32 %v1325_v54, %v1048_v58  ;;  %v1444_v61 = vpop.f32.mrb[10].mxu0 }
 0x351   : > { %v1089_v63 = vmul.f32 %v1057_v57, %v535_v52  ;;  %v1060_v1 = vadd.f32 %v1444_v61, %v1325_v54  ;;  %v1051_v2 = vpop.f32.mrb[11].mxu0 }
 0x352   : > { %v1087_v3 = vmul.f32 %v1049_v60, %v529_v51  ;;  %v1052_v4 = vadd.f32 %v1325_v54, %v1051_v2 }
 0x353   : > { %v1097_v7 = vadd.f32 %v1089_v63, %v1081_v59  ;;  %v1090_v9 = vmul.f32 %v1060_v1, %v538_v55 }
 0x354   : > { %v1095_v10 = vadd.f32 %v1087_v3, %v1079_v0  ;;  %v1088_v11 = vmul.f32 %v1052_v4, %v532_v53 }
 0x355   : > { %1105 = vst [vmem:[#allocation8 + $0x10] sm:$0xff] %v1097_v7  ;;  %v1098_v12 = vadd.f32 %v1090_v9, %v1082_v5 }
 0x356   : > { %1103 = vst [vmem:[#allocation8] sm:$0xff] %v1095_v10  ;;  %v1096_v13 = vadd.f32 %v1088_v11, %v1080_v8  ;;  %v1447_v14 = vpop.f32.mrb[8].mxu1 }
 0x357   : > { %1106 = vst [vmem:[#allocation8 + $0x18] sm:$0xff] %v1098_v12  ;;  %v1073_v16 = vadd.f32 %v1447_v14, %v1325_v54  ;;  %v1064_v17 = vpop.f32.mrb[9].mxu1 }
 0x358   : > { %1104 = vst [vmem:[#allocation8 + $0x8] sm:$0xff] %v1096_v13  ;;  %v1065_v18 = vadd.f32 %v1325_v54, %v1064_v17  ;;  %v1448_v19 = vpop.f32.mrb[10].mxu1 }
 0x359   : > { %v1076_v22 = vadd.f32 %v1448_v19, %v1325_v54  ;;  %v1093_v24 = vmul.f32 %v1073_v16, %v547_v15  ;;  %v1067_v25 = vpop.f32.mrb[11].mxu1 }
 0x35a   : > { %v1091_v26 = vmul.f32 %v1065_v18, %v541_v62  ;;  %v1068_v27 = vadd.f32 %v1325_v54, %v1067_v25 }
 0x35b   : > { %v1101_v29 = vadd.f32 %v1093_v24, %v1085_v20  ;;  %v1094_v31 = vmul.f32 %v1076_v22, %v550_v21 }
 0x35c   : > { %v1099_v32 = vadd.f32 %v1091_v26, %v1083_v23  ;;  %v1092_v33 = vmul.f32 %v1068_v27, %v544_v6 }
 0x35d   : > { %1109 = vst [vmem:[#allocation8 + $0x30] sm:$0xff] %v1101_v29  ;;  %v1102_v34 = vadd.f32 %v1094_v31, %v1086_v28 }
 0x35e   : > { %1107 = vst [vmem:[#allocation8 + $0x20] sm:$0xff] %v1099_v32  ;;  %v1100_v35 = vadd.f32 %v1092_v33, %v1084_v30 }
 0x35f   : > { %1110 = vst [vmem:[#allocation8 + $0x38] sm:$0xff] %v1102_v34 }
 0x360   : > { %1108 = vst [vmem:[#allocation8 + $0x28] sm:$0xff] %v1100_v35 }
 0x361   : > { %1705 = shalt.err (!%p1702_p5)
}
 0x362   : > { %s1706_s22 = scalar_lea.hbm %s2217_s8, 1024 }
 0x363   : > { %p1707_p13 = scmp.ne.s32.totalorder %s2217_s8, %s1706_s22  ;;  %p1712_p11 = scmp.lt.u32.totalorder %s1706_s22, %s2217_s8 }
 0x365   : > { %p1708_p1 = pnand %p1707_p13, %p1486_p7 }
 0x367   : > { %p1709_p12 = pneg %p1708_p1 }
 0x369   : > { %p1714_p9 = pnand %p1712_p11, %p1709_p12 }
 0x36b   : > { %1717 = shalt.err (!%p1714_p9)
}
 0x36c   : > { %s1785_s9 = smov 128   ;;  %s1786_s20 = smov 8  }
 0x36d   : > { %1472 = dma.vmem_to_hbm [thread:$0]  (%p1486_p7), %s1121_s15, 1024, %s2217_s8, [#allocation4], %s1785_s9, %s1785_s9, %s1786_s20  }
 0x36e   : > { %1751 = dma.done.wait (%p1486_p7), [#allocation4], 1024  }
 0x36f   : > { %1753 = vsyncadd (%p1486_p7), [#allocation4], 4294966272 }
 0x370 PF: > { %s25_s10 = sadd.s32 1, %s1776_s10   ;;  %s2245_s17 = sld [smem:[#allocation14_spill]] }
 0x371   : > { %p22_p2 = scmp.ge.s32.totalorder %s25_s10, 6   ;;  %s2246_s30 = sld [smem:[#allocation12_spill]] }
 0x372   : > { %s2247_s9 = sld [smem:[#allocation13_spill]]  ;;  %s2248_s27 = smov %s1760_s28 }
 0x373   : > { %s2249_s28 = smov %s1764_s29  ;;  %24 = sbr.rel (!%p22_p2) target bundleno = 10 (0xa), region = 133 }
 0x376   : > { %s2250_s29 = smov %s2245_s17 }
 0x37a   :  { %1136 = vsyncpa [#allocation3], 1 }
 0x37b   :  { %1138 = vsyncpa [#allocation3 + $0x1], 1 }
 0x37c   :  { %1139 = vsyncpa [#allocation6], 1 }
 0x37d   :  { %1141 = vsyncpa [#allocation6 + $0x1], 1 }
 0x37e   :  { %1142 = vsyncpa [#allocation4], 1 }
 0x37f   :  { %1144 = vsyncpa [#allocation4 + $0x1], 1 }

</bundles_post_ra>
